<compile_context>
chip_gen: v7x
topology: tpu7x:2x2x1
jax: 0.10.0
libtpu: 0.0.40
codegen_flags: <defaults>
</compile_context>

<pallas_src>
import math

import jax
import jax.numpy as jnp
from jax.experimental import pallas as pl
from jax.experimental.pallas import tpu as pltpu


def _round_up(x, m):
    return (x + m - 1) // m * m


def _linear_bias_kernel(x_ref, w_ref, b_ref, o_ref):
    """One (tm, tn) output tile: single fused-K MXU matmul + f32 bias add."""
    o_ref[...] = (
        jnp.dot(x_ref[...], w_ref[...], preferred_element_type=jnp.float32)
        + b_ref[...]
    ).astype(o_ref.dtype)


def projection_head_forward(
    x, w_t, b, *, tm=None, tn=None, compute_dtype=jnp.bfloat16, out_dtype=None
):
    """x: (B, K), w_t: (K, N), b: (1, N) -> (B, N) = x @ w_t + b."""
    B, K = x.shape
    K2, N = w_t.shape
    assert K == K2, (K, K2)
    assert b.shape == (1, N), b.shape
    if out_dtype is None:
        out_dtype = x.dtype
    out_isz = jnp.dtype(out_dtype).itemsize
    in_isz = jnp.dtype(compute_dtype).itemsize

    # ---------------- tile selection (K fully fused, lane-dense N) ----------
    if tm is None:
        if B % 128 == 0 and B >= 256:
            # >=2 row blocks so both TensorCores on v7x get work; on
            # single-TC v5e/v6e this only costs ~0.35us of extra step overhead.
            tm = 128
        elif B <= 1024:
            tm = B  # single row block, no M padding (block dim == full dim).
        else:
            tm = 128  # large ragged batch: fall back to padded 128 blocks.
    if tn is None:
        tn = min(_round_up(N, 128), 1024)

    Mp = B if B % tm == 0 else _round_up(B, tm)
    Np = _round_up(N, tn)
    gm, gn = Mp // tm, Np // tn

    # ---------------- operands: cast (only if needed) and pad N once --------
    x_c = x if x.dtype == compute_dtype else x.astype(compute_dtype)
    w_c = w_t if w_t.dtype == compute_dtype else w_t.astype(compute_dtype)
    b_f = b if b.dtype == jnp.float32 else b.astype(jnp.float32)

    if Mp != B:
        x_c = jnp.pad(x_c, ((0, Mp - B), (0, 0)))
    if Np != N:
        w_c = jnp.pad(w_c, ((0, 0), (0, Np - N)))
        b_f = jnp.pad(b_f, ((0, 0), (0, Np - N)))

    # ---------------- cost / VMEM hints --------------------------------------
    cost = pl.CostEstimate(
        flops=2 * Mp * Np * K,
        transcendentals=0,
        bytes_accessed=(
            Mp * K * in_isz * gn      # x re-read per N block
            + K * Np * in_isz * gm    # w re-read per M block
            + Np * 4 * gm
            + Mp * Np * out_isz
        ),
    )

    # double-buffered x/w/bias tiles + double-buffered output tile
    vmem_est = 2 * (tm * K + K * tn) * in_isz + 2 * tn * 4 + 2 * tm * tn * out_isz
    cparams = dict(dimension_semantics=("parallel", "parallel"))
    if vmem_est > (12 << 20):
        cparams["vmem_limit_bytes"] = int(min(vmem_est + (4 << 20), 64 << 20))

    y_p = pl.pallas_call(
        _linear_bias_kernel,
        out_shape=jax.ShapeDtypeStruct((Mp, Np), out_dtype),
        grid=(gm, gn),
        in_specs=[
            pl.BlockSpec((tm, K), lambda i, j: (i, 0)),
            pl.BlockSpec((K, tn), lambda i, j: (0, j)),
            pl.BlockSpec((1, tn), lambda i, j: (0, j)),
        ],
        out_specs=pl.BlockSpec((tm, tn), lambda i, j: (i, j)),
        compiler_params=pltpu.CompilerParams(**cparams),
        cost_estimate=cost,
    )(x_c, w_c, b_f)

    if (Mp, Np) != (B, N):
        y_p = y_p[:B, :N]
    return y_p


def init_projection_head_params(
    key, in_features, out_features, param_dtype=jnp.bfloat16
):
    """nn.Linear-style init (uniform +/- 1/sqrt(in)); weight stored (in, out)
    and already cast to the MXU compute dtype so no per-forward cast/copy."""
    k_w, k_b = jax.random.split(key)
    bound = 1.0 / math.sqrt(in_features)
    w_t = jax.random.uniform(
        k_w, (in_features, out_features), jnp.float32, minval=-bound, maxval=bound
    ).astype(param_dtype)
    b = jax.random.uniform(
        k_b, (1, out_features), jnp.float32, minval=-bound, maxval=bound
    )
    return w_t, b


if __name__ == "__main__":
    key = jax.random.PRNGKey(0)
    k_x, k_p = jax.random.split(key)

    # Small batch; in_features=2048 is fixed by the ResNet50 feature width,
    # emb_size=128 matches the module default.
    batch, in_features, emb_size = 8, 2048, 128
    x = jax.random.normal(k_x, (batch, in_features), jnp.float32)
    w_t, b = init_projection_head_params(k_p, in_features, emb_size)

    y = projection_head_forward(x, w_t, b)
    y = jax.block_until_ready(y)

    # Reference with matching bf16 matmul operands, f32 accumulation + bias.
    y_ref = (
        jnp.dot(x.astype(jnp.bfloat16).astype(jnp.float32), w_t.astype(jnp.float32))
        + b
    )
    assert y.shape == (batch, emb_size)
    assert jnp.allclose(y, y_ref, atol=1e-2, rtol=1e-2), float(
        jnp.max(jnp.abs(y - y_ref))
    )

    print("KERNEL_OK")
</pallas_src>

<mosaic_0001>
module attributes {stable_mosaic.version = 11 : i64} {
  func.func @_linear_bias_kernel(%arg0: i32, %arg1: i32, %arg2: memref<8x2048xbf16, #tpu.memory_space<vmem>>, %arg3: memref<2048x128xbf16, #tpu.memory_space<vmem>>, %arg4: memref<1x128xf32, #tpu.memory_space<vmem>>, %arg5: memref<8x128xf32, #tpu.memory_space<vmem>>) attributes {dimension_semantics = [#tpu.dimension_semantics<parallel>, #tpu.dimension_semantics<parallel>], iteration_bounds = array<i64: 1, 1>, scalar_prefetch = 0 : i64, scratch_operands = 0 : i64, tpu.core_type = #tpu.core_type<tc>, window_params = [{transform_indices = @transform_0, window_bounds = array<i64: 8, 2048>}, {transform_indices = @transform_1, window_bounds = array<i64: 2048, 128>}, {transform_indices = @transform_2, window_bounds = array<i64: 1, 128>}, {transform_indices = @transform_3, window_bounds = array<i64: 8, 128>}]} {
    %c0 = arith.constant 0 : index
    %c0_0 = arith.constant 0 : index
    %0 = vector.load %arg2[%c0, %c0_0] : memref<8x2048xbf16, #tpu.memory_space<vmem>>, vector<8x2048xbf16>
    %c0_1 = arith.constant 0 : index
    %c0_2 = arith.constant 0 : index
    %1 = vector.load %arg3[%c0_1, %c0_2] : memref<2048x128xbf16, #tpu.memory_space<vmem>>, vector<2048x128xbf16>
    %cst = arith.constant dense<0.000000e+00> : vector<8x128xf32>
    %2 = tpu.matmul %0, %1, %cst {dimension_numbers = #tpu.dot_dimension_numbers<[1], [0], [0], [1], [0, 0, 1, 1], [], []>} : vector<8x2048xbf16>, vector<2048x128xbf16>, vector<8x128xf32> -> vector<8x128xf32>
    %c0_3 = arith.constant 0 : index
    %c0_4 = arith.constant 0 : index
    %3 = vector.load %arg4[%c0_3, %c0_4] : memref<1x128xf32, #tpu.memory_space<vmem>>, vector<1x128xf32>
    %4 = vector.broadcast %3 : vector<1x128xf32> to vector<8x128xf32>
    %5 = arith.addf %2, %4 : vector<8x128xf32>
    %c0_5 = arith.constant 0 : index
    %c0_6 = arith.constant 0 : index
    %6 = vector.load %arg5[%c0_5, %c0_6] : memref<8x128xf32, #tpu.memory_space<vmem>>, vector<8x128xf32>
    tpu.vector_store %arg5[%c0_5, %c0_6], %5 {strides = array<i32>} : memref<8x128xf32, #tpu.memory_space<vmem>>, vector<8x128xf32>,
    return
  }
  func.func @transform_0(%arg0: i32, %arg1: i32) -> (i32, i32) {
    %c0_i32 = arith.constant 0 : i32
    %c0_i32_0 = arith.constant 0 : i32
    return %arg0, %c0_i32 : i32, i32
  }
  func.func @transform_1(%arg0: i32, %arg1: i32) -> (i32, i32) {
    %c0_i32 = arith.constant 0 : i32
    %c0_i32_0 = arith.constant 0 : i32
    return %c0_i32, %arg1 : i32, i32
  }
  func.func @transform_2(%arg0: i32, %arg1: i32) -> (i32, i32) {
    %c0_i32 = arith.constant 0 : i32
    %c0_i32_0 = arith.constant 0 : i32
    return %c0_i32, %arg1 : i32, i32
  }
  func.func @transform_3(%arg0: i32, %arg1: i32) -> (i32, i32) {
    %c0_i32 = arith.constant 0 : i32
    return %arg0, %arg1 : i32, i32
  }
}

</mosaic_0001>

<bundles_post_ra>
// kernel: tpu_custom_call.1
= control target key start
LH: loop header
LB: loop body
LE: loop exit
PB: predicated region body
PF: predicated region fallthrough
CT: control target
= control target key end

     0   :  { %8 = vsyncpa [#allocation3], 0  ;;  %s2087_s0 = inlined_call_operand.hbm [shape: bf16[8,2048], index: 0, kind: input, shape index: {}]   ;;  %s2088_s1 = inlined_call_operand.hbm [shape: bf16[2048,128], index: 1, kind: input, shape index: {}]   ;;  %s2089_s2 = inlined_call_operand.vmem [shape: f32[1,128], index: 2, kind: input, shape index: {}]   ;;  %s2090_s3 = inlined_call_operand.hbm [shape: f32[8,128], index: 3, kind: output, shape index: {}]  }
   0x1   :  { %9 = vsyncpa [#allocation6], 0 }
   0x2   :  { %10 = vsyncpa [#allocation4], 0  ;;  %s2016_s12 = smov [#allocation2]   ;;  %s2017_s14 = smov [#allocation5]  }
   0x3   :  { %s17_s13 = sshll.u32 %s2016_s12, 4  ;;  %s26_s15 = sshll.u32 %s2017_s14, 4  ;;  %s18_s13 = int_to_ptr.vmem [resolvable:$true] %s17_s13  ;;  %s2041_s15 = int_to_ptr.vmem [resolvable:$true] %s26_s15 }
   0x4   :  { %s1944_s18 = scalar_lea.hbm %s2087_s0, 1024 }
   0x5   :  { %p1945_p0 = scmp.ne.s32.totalorder %s2087_s0, %s1944_s18  ;;  %p1948_p1 = scmp.lt.u32.totalorder %s1944_s18, %s2087_s0 }
   0x7   :  { %p1950_p2 = pnand %p1948_p1, %p1945_p0 }
   0x9   :  { %1953 = shalt.err (!%p1950_p2)
}
   0xa   :  { %s1954_s23 = scalar_lea.vmem %s18_s13, 1024  ;;  %p1959_p4 = scmp.lt.s32.totalorder %s18_s13, %s18_s13 }
   0xb   :  { %p1955_p3 = scmp.ne.s32.totalorder %s18_s13, %s1954_s23  ;;  %p1960_p5 = scmp.lt.s32.totalorder %s1954_s23, %s1954_s23 }
   0xd   :  { %p1961_p6 = por %p1960_p5, %p1959_p4 }
   0xf   :  { %p1962_p7 = pnand %p1961_p6, %p1955_p3 }
  0x11   :  { %1965 = shalt.err (!%p1962_p7)
}
  0x12   :  { %20 = dma.hbm_to_vmem [thread:$0]  %s2087_s0, 1024, %s18_s13, [#allocation3]  }
  0x13   :  { %s1966_s28 = scalar_lea.hbm %s2088_s1, 16384 }
  0x14   :  { %p1967_p8 = scmp.ne.s32.totalorder %s2088_s1, %s1966_s28  ;;  %p1970_p9 = scmp.lt.u32.totalorder %s1966_s28, %s2088_s1 }
  0x16   :  { %p1972_p10 = pnand %p1970_p9, %p1967_p8 }
  0x18   :  { %1975 = shalt.err (!%p1972_p10)
}
  0x19   :  { %s1976_s6 = scalar_lea.vmem %s2041_s15, 16384  ;;  %p1981_p12 = scmp.lt.s32.totalorder %s2041_s15, %s2041_s15 }
  0x1a   :  { %p1977_p11 = scmp.ne.s32.totalorder %s2041_s15, %s1976_s6  ;;  %p1982_p13 = scmp.lt.s32.totalorder %s1976_s6, %s1976_s6 }
  0x1c   :  { %p1983_p0 = por %p1982_p13, %p1981_p12 }
  0x1e   :  { %p1984_p1 = pnand %p1983_p0, %p1977_p11 }
  0x20   :  { %1987 = shalt.err (!%p1984_p1)
}
  0x21   :  { %s2018_s0 = smov 64   ;;  %s2019_s7 = smov 4  }
  0x22   :  { %32 = dma.hbm_to_vmem [thread:$0]  %s2088_s1, 16384, %s2041_s15, [#allocation6], %s2018_s0, %s2018_s0, %s2019_s7  }
  0x23   :  { %2010 = dma.done.wait [#allocation3], 1024  }
  0x24   :  { %2011 = vsyncadd [#allocation3], 4294966272 }
  0x25   :  { %2012 = dma.done.wait [#allocation6], 16384  }
  0x26   :  { %2013 = vsyncadd [#allocation6], 4294950912  ;;  %v1800_v0 = vld [vmem:[#allocation5 + $0x40] sm:$0xff]   ;;  %v1804_v4 = vld [vmem:[#allocation5 + $0x48] sm:$0xff]  }
  0x27   :  { %v1801_v1 = vld [vmem:[#allocation5 + $0xc0] sm:$0xff]   ;;  %1619 = vmatprep.subr.bf16.mxu0 %v1800_v0  ;;  %v1805_v5 = vld [vmem:[#allocation5 + $0xc8] sm:$0xff]   ;;  %v1808_v8 = vld [vmem:[#allocation5 + $0x50] sm:$0xff]  }
  0x28   :  { %v1802_v2 = vld [vmem:[#allocation5] sm:$0xff]   ;;  %1641 = vmatprep.subr.bf16.mxu1 %v1801_v1  ;;  %v1806_v6 = vld [vmem:[#allocation5 + $0x8] sm:$0xff]   ;;  %v1809_v9 = vld [vmem:[#allocation5 + $0xd0] sm:$0xff]  }
  0x29   :  { %v1803_v3 = vld [vmem:[#allocation5 + $0x80] sm:$0xff]   ;;  %1620 = vmatpush3.bf16.msra.mxu0 %v1802_v2  ;;  %v1807_v7 = vld [vmem:[#allocation5 + $0x88] sm:$0xff]   ;;  %v1810_v10 = vld [vmem:[#allocation5 + $0x10] sm:$0xff]  }
  0x2a   :  { %1642 = vmatpush3.bf16.msra.mxu1 %v1803_v3  ;;  %1621 = vmatprep.subr.bf16.mxu0 %v1804_v4  ;;  %v1811_v11 = vld [vmem:[#allocation5 + $0x90] sm:$0xff]   ;;  %v1812_v12 = vld [vmem:[#allocation5 + $0x58] sm:$0xff]   ;;  %v1816_v16 = vld [vmem:[#allocation5 + $0x60] sm:$0xff]  }
  0x2b   :  { %1643 = vmatprep.subr.bf16.mxu1 %v1805_v5  ;;  %v1813_v13 = vld [vmem:[#allocation5 + $0xd8] sm:$0xff]   ;;  %v1817_v17 = vld [vmem:[#allocation5 + $0xe0] sm:$0xff]   ;;  %v1820_v20 = vld [vmem:[#allocation5 + $0x68] sm:$0xff]  }
  0x2c   :  { %v1814_v14 = vld [vmem:[#allocation5 + $0x18] sm:$0xff]   ;;  %v1818_v18 = vld [vmem:[#allocation5 + $0x20] sm:$0xff]   ;;  %v1821_v21 = vld [vmem:[#allocation5 + $0xe8] sm:$0xff]  }
  0x2d   :  { %1622 = vmatpush3.bf16.msra.mxu0 %v1806_v6  ;;  %v1815_v15 = vld [vmem:[#allocation5 + $0x98] sm:$0xff]   ;;  %v1819_v19 = vld [vmem:[#allocation5 + $0xa0] sm:$0xff]   ;;  %v1822_v22 = vld [vmem:[#allocation5 + $0x28] sm:$0xff]  }
  0x2e   :  { %1644 = vmatpush3.bf16.msra.mxu1 %v1807_v7  ;;  %1623 = vmatprep.subr.bf16.mxu0 %v1808_v8  ;;  %v1823_v23 = vld [vmem:[#allocation5 + $0xa8] sm:$0xff]   ;;  %v1824_v24 = vld [vmem:[#allocation5 + $0x70] sm:$0xff]   ;;  %v1828_v28 = vld [vmem:[#allocation5 + $0x78] sm:$0xff]  }
  0x2f   :  { %1645 = vmatprep.subr.bf16.mxu1 %v1809_v9  ;;  %v1825_v25 = vld [vmem:[#allocation5 + $0xf0] sm:$0xff]   ;;  %v1829_v29 = vld [vmem:[#allocation5 + $0xf8] sm:$0xff]   ;;  %v42_v32 = vld [vmem:[#allocation2] sm:$0xff] }
  0x30   :  { %v1826_v26 = vld [vmem:[#allocation5 + $0x30] sm:$0xff]   ;;  %v1830_v30 = vld [vmem:[#allocation5 + $0x38] sm:$0xff]   ;;  %v43_v33 = vld [vmem:[#allocation2 + $0x8] sm:$0xff]  ;;  %v1475_v34 = vcombine.low %v42_v32, %v42_v32  ;;  %v1476_v35 = vcombine.high %v42_v32, %v42_v32 }
  0x31   :  { %1624 = vmatpush3.bf16.msra.mxu0 %v1810_v10  ;;  %v1827_v27 = vld [vmem:[#allocation5 + $0xb0] sm:$0xff]   ;;  %v1831_v31 = vld [vmem:[#allocation5 + $0xb8] sm:$0xff]   ;;  %v1477_v36 = vcombine.low %v43_v33, %v43_v33  ;;  %v1478_v37 = vcombine.high %v43_v33, %v43_v33  ;;  %v1836_v38 = vld [vmem:[#allocation5 + $0x140] sm:$0xff]  }
  0x32   :  { %1646 = vmatpush3.bf16.msra.mxu1 %v1811_v11  ;;  %1625 = vmatprep.subr.bf16.mxu0 %v1812_v12  ;;  %v1837_v39 = vld [vmem:[#allocation5 + $0x1c0] sm:$0xff]   ;;  %v1840_v42 = vld [vmem:[#allocation5 + $0x148] sm:$0xff]   ;;  %v1844_v46 = vld [vmem:[#allocation5 + $0x150] sm:$0xff]  }
  0x33   :  { %1647 = vmatprep.subr.bf16.mxu1 %v1813_v13  ;;  %1169 = vmatprep.mubr.bf16.mxu0 %v1476_v35  ;;  %v1838_v40 = vld [vmem:[#allocation5 + $0x100] sm:$0xff]   ;;  %v1841_v43 = vld [vmem:[#allocation5 + $0x1c8] sm:$0xff]   ;;  %v1845_v47 = vld [vmem:[#allocation5 + $0x1d0] sm:$0xff]  }
  0x34   :  { %1209 = vmatprep.mubr.bf16.mxu1 %v1478_v37  ;;  %v1839_v41 = vld [vmem:[#allocation5 + $0x180] sm:$0xff]   ;;  %v1842_v44 = vld [vmem:[#allocation5 + $0x108] sm:$0xff]   ;;  %v1846_v48 = vld [vmem:[#allocation5 + $0x110] sm:$0xff]  }
  0x35   :  { %1626 = vmatpush3.bf16.msra.mxu0 %v1814_v14  ;;  %v1843_v45 = vld [vmem:[#allocation5 + $0x188] sm:$0xff]   ;;  %v1847_v49 = vld [vmem:[#allocation5 + $0x190] sm:$0xff]   ;;  %v1848_v50 = vld [vmem:[#allocation5 + $0x158] sm:$0xff]  }
  0x36   :  { %1648 = vmatpush3.bf16.msra.mxu1 %v1815_v15  ;;  %1627 = vmatprep.subr.bf16.mxu0 %v1816_v16  ;;  %v1849_v51 = vld [vmem:[#allocation5 + $0x1d8] sm:$0xff]   ;;  %v1852_v54 = vld [vmem:[#allocation5 + $0x160] sm:$0xff]   ;;  %v1856_v58 = vld [vmem:[#allocation5 + $0x168] sm:$0xff]  }
  0x37   :  { %1649 = vmatprep.subr.bf16.mxu1 %v1817_v17  ;;  %v1850_v52 = vld [vmem:[#allocation5 + $0x118] sm:$0xff]   ;;  %v1853_v55 = vld [vmem:[#allocation5 + $0x1e0] sm:$0xff]   ;;  %v1857_v59 = vld [vmem:[#allocation5 + $0x1e8] sm:$0xff]  }
  0x38   :  { %v1851_v53 = vld [vmem:[#allocation5 + $0x198] sm:$0xff]   ;;  %v1854_v56 = vld [vmem:[#allocation5 + $0x120] sm:$0xff]   ;;  %v1858_v60 = vld [vmem:[#allocation5 + $0x128] sm:$0xff]  }
  0x39   :  { %1628 = vmatpush3.bf16.msra.mxu0 %v1818_v18  ;;  %v1855_v57 = vld [vmem:[#allocation5 + $0x1a0] sm:$0xff]   ;;  %v1859_v61 = vld [vmem:[#allocation5 + $0x1a8] sm:$0xff]   ;;  %v1860_v62 = vld [vmem:[#allocation5 + $0x170] sm:$0xff]  }
  0x3a   :  { %1650 = vmatpush3.bf16.msra.mxu1 %v1819_v19  ;;  %1629 = vmatprep.subr.bf16.mxu0 %v1820_v20  ;;  %v1861_v63 = vld [vmem:[#allocation5 + $0x1f0] sm:$0xff]   ;;  %v1864_v2 = vld [vmem:[#allocation5 + $0x178] sm:$0xff]   ;;  %v1872_v12 = vld [vmem:[#allocation5 + $0x240] sm:$0xff]  }
  0x3b   :  { %1651 = vmatprep.subr.bf16.mxu1 %v1821_v21  ;;  %v1862_v0 = vld [vmem:[#allocation5 + $0x130] sm:$0xff]   ;;  %v1865_v3 = vld [vmem:[#allocation5 + $0x1f8] sm:$0xff]   ;;  %v1873_v13 = vld [vmem:[#allocation5 + $0x2c0] sm:$0xff]  }
  0x3c   :  { %v1863_v1 = vld [vmem:[#allocation5 + $0x1b0] sm:$0xff]   ;;  %v1866_v4 = vld [vmem:[#allocation5 + $0x138] sm:$0xff]   ;;  %v1874_v14 = vld [vmem:[#allocation5 + $0x200] sm:$0xff]  }
  0x3d   :  { %1630 = vmatpush3.bf16.msra.mxu0 %v1822_v22  ;;  %v1867_v5 = vld [vmem:[#allocation5 + $0x1b8] sm:$0xff]   ;;  %v44_v6 = vld [vmem:[#allocation2 + $0x10] sm:$0xff]  ;;  %v1875_v15 = vld [vmem:[#allocation5 + $0x280] sm:$0xff]  }
  0x3e   :  { %1652 = vmatpush3.bf16.msra.mxu1 %v1823_v23  ;;  %1631 = vmatprep.subr.bf16.mxu0 %v1824_v24  ;;  %v1479_v7 = vcombine.low %v44_v6, %v44_v6  ;;  %v1480_v8 = vcombine.high %v44_v6, %v44_v6  ;;  %v45_v9 = vld [vmem:[#allocation2 + $0x18] sm:$0xff]  ;;  %v1876_v16 = vld [vmem:[#allocation5 + $0x248] sm:$0xff]   ;;  %v1880_v20 = vld [vmem:[#allocation5 + $0x250] sm:$0xff]  }
  0x3f   :  { %1653 = vmatprep.subr.bf16.mxu1 %v1825_v25  ;;  %v1481_v10 = vcombine.low %v45_v9, %v45_v9  ;;  %v1482_v11 = vcombine.high %v45_v9, %v45_v9  ;;  %v1877_v17 = vld [vmem:[#allocation5 + $0x2c8] sm:$0xff]   ;;  %v1881_v21 = vld [vmem:[#allocation5 + $0x2d0] sm:$0xff]   ;;  %v1884_v24 = vld [vmem:[#allocation5 + $0x258] sm:$0xff]  }
  0x40   :  { %v1878_v18 = vld [vmem:[#allocation5 + $0x208] sm:$0xff]   ;;  %v1882_v22 = vld [vmem:[#allocation5 + $0x210] sm:$0xff]   ;;  %v1885_v25 = vld [vmem:[#allocation5 + $0x2d8] sm:$0xff]  }
  0x41   :  { %1632 = vmatpush3.bf16.msra.mxu0 %v1826_v26  ;;  %v1879_v19 = vld [vmem:[#allocation5 + $0x288] sm:$0xff]   ;;  %v1883_v23 = vld [vmem:[#allocation5 + $0x290] sm:$0xff]   ;;  %v1886_v26 = vld [vmem:[#allocation5 + $0x218] sm:$0xff]  }
  0x42   :  { %1654 = vmatpush3.bf16.msra.mxu1 %v1827_v27  ;;  %1633 = vmatprep.subr.bf16.mxu0 %v1828_v28  ;;  %v1887_v27 = vld [vmem:[#allocation5 + $0x298] sm:$0xff]   ;;  %v1888_v28 = vld [vmem:[#allocation5 + $0x260] sm:$0xff]   ;;  %v1892_v32 = vld [vmem:[#allocation5 + $0x268] sm:$0xff]  }
  0x43   :  { %1655 = vmatprep.subr.bf16.mxu1 %v1829_v29  ;;  %v1889_v29 = vld [vmem:[#allocation5 + $0x2e0] sm:$0xff]   ;;  %v1893_v33 = vld [vmem:[#allocation5 + $0x2e8] sm:$0xff]   ;;  %v1897_v37 = vld [vmem:[#allocation5 + $0x2f0] sm:$0xff]  }
  0x44   :  { %v1895_v35 = vld [vmem:[#allocation5 + $0x2a8] sm:$0xff]  }
  0x45   :  { %1634 = vmatpush3.bf16.msra.mxu0 %v1830_v30  ;;  %v1890_v30 = vld [vmem:[#allocation5 + $0x220] sm:$0xff]   ;;  %v1928_v6 = vld [vmem:[#allocation5 + $0x368] sm:$0xff]  }
  0x46   :  { %1656 = vmatpush3.bf16.msra.mxu1 %v1831_v31  ;;  %1663 = vmatprep.subr.bf16.mxu0 %v1836_v38  ;;  %v1891_v31 = vld [vmem:[#allocation5 + $0x2a0] sm:$0xff]   ;;  %v1898_v38 = vld [vmem:[#allocation5 + $0x230] sm:$0xff]   ;;  %v1931_v9 = vld [vmem:[#allocation5 + $0x3a8] sm:$0xff]  }
  0x47   :  { %1685 = vmatprep.subr.bf16.mxu1 %v1837_v39  ;;  %v1899_v39 = vld [vmem:[#allocation5 + $0x2b0] sm:$0xff]  }
  0x48   :  { %1170 = vmatmul.mubr.bf16.vlgmr.msra.gmra.mrb[0].mxu0 %v1475_v34  ;;  %v1894_v34 = vld [vmem:[#allocation5 + $0x228] sm:$0xff]  }
  0x49   :  { %1210 = vmatmul.mubr.bf16.vlgmr.msra.gmra.mrb[0].mxu1 %v1477_v36  ;;  %1664 = vmatpush3.bf16.msra.mxu0 %v1838_v40  ;;  %v1896_v36 = vld [vmem:[#allocation5 + $0x270] sm:$0xff]   ;;  %v1900_v40 = vld [vmem:[#allocation5 + $0x278] sm:$0xff]  }
  0x4a   :  { %1686 = vmatpush3.bf16.msra.mxu1 %v1839_v41  ;;  %1665 = vmatprep.subr.bf16.mxu0 %v1840_v42  ;;  %v1901_v41 = vld [vmem:[#allocation5 + $0x2f8] sm:$0xff]  }
  0x4b   :  { %1687 = vmatprep.subr.bf16.mxu1 %v1841_v43  ;;  %1249 = vmatprep.mubr.bf16.mxu0 %v1480_v8  ;;  %v1902_v42 = vld [vmem:[#allocation5 + $0x238] sm:$0xff]   ;;  %v1930_v8 = vld [vmem:[#allocation5 + $0x328] sm:$0xff]  }
  0x4c   :  { %1289 = vmatprep.mubr.bf16.mxu1 %v1482_v11  ;;  %v1903_v43 = vld [vmem:[#allocation5 + $0x2b8] sm:$0xff]   ;;  %v1933_v11 = vld [vmem:[#allocation5 + $0x3f0] sm:$0xff]  }
  0x4d   :  { %1666 = vmatpush3.bf16.msra.mxu0 %v1842_v44  ;;  %v46_v44 = vld [vmem:[#allocation2 + $0x20] sm:$0xff] }
  0x4e   :  { %1688 = vmatpush3.bf16.msra.mxu1 %v1843_v45  ;;  %1667 = vmatprep.subr.bf16.mxu0 %v1844_v46  ;;  %v47_v45 = vld [vmem:[#allocation2 + $0x28] sm:$0xff]  ;;  %v1483_v46 = vcombine.low %v46_v44, %v46_v44 }
  0x4f   :  { %1689 = vmatprep.subr.bf16.mxu1 %v1845_v47  ;;  %v1484_v47 = vcombine.high %v46_v44, %v46_v44 }
  0x51   :  { %1668 = vmatpush3.bf16.msra.mxu0 %v1846_v48  ;;  %v1485_v48 = vcombine.low %v47_v45, %v47_v45 }
  0x52   :  { %1690 = vmatpush3.bf16.msra.mxu1 %v1847_v49  ;;  %1669 = vmatprep.subr.bf16.mxu0 %v1848_v50  ;;  %v1486_v49 = vcombine.high %v47_v45, %v47_v45  ;;  %v1908_v50 = vld [vmem:[#allocation5 + $0x340] sm:$0xff]  }
  0x53   :  { %1691 = vmatprep.subr.bf16.mxu1 %v1849_v51  ;;  %v1909_v51 = vld [vmem:[#allocation5 + $0x3c0] sm:$0xff]  }
  0x55   :  { %1670 = vmatpush3.bf16.msra.mxu0 %v1850_v52  ;;  %v1910_v52 = vld [vmem:[#allocation5 + $0x300] sm:$0xff]  }
  0x56   :  { %1692 = vmatpush3.bf16.msra.mxu1 %v1851_v53  ;;  %1671 = vmatprep.subr.bf16.mxu0 %v1852_v54  ;;  %v1911_v53 = vld [vmem:[#allocation5 + $0x380] sm:$0xff]   ;;  %v1912_v54 = vld [vmem:[#allocation5 + $0x348] sm:$0xff]  }
  0x57   :  { %1693 = vmatprep.subr.bf16.mxu1 %v1853_v55  ;;  %v1913_v55 = vld [vmem:[#allocation5 + $0x3c8] sm:$0xff]  }
  0x59   :  { %1672 = vmatpush3.bf16.msra.mxu0 %v1854_v56  ;;  %v1914_v56 = vld [vmem:[#allocation5 + $0x308] sm:$0xff]  }
  0x5a   :  { %1694 = vmatpush3.bf16.msra.mxu1 %v1855_v57  ;;  %1673 = vmatprep.subr.bf16.mxu0 %v1856_v58  ;;  %v1915_v57 = vld [vmem:[#allocation5 + $0x388] sm:$0xff]   ;;  %v1916_v58 = vld [vmem:[#allocation5 + $0x350] sm:$0xff]  }
  0x5b   :  { %1695 = vmatprep.subr.bf16.mxu1 %v1857_v59  ;;  %v1917_v59 = vld [vmem:[#allocation5 + $0x3d0] sm:$0xff]  }
  0x5d   :  { %1674 = vmatpush3.bf16.msra.mxu0 %v1858_v60  ;;  %v1918_v60 = vld [vmem:[#allocation5 + $0x310] sm:$0xff]  }
  0x5e   :  { %1696 = vmatpush3.bf16.msra.mxu1 %v1859_v61  ;;  %1675 = vmatprep.subr.bf16.mxu0 %v1860_v62  ;;  %v1919_v61 = vld [vmem:[#allocation5 + $0x390] sm:$0xff]   ;;  %v1920_v62 = vld [vmem:[#allocation5 + $0x358] sm:$0xff]  }
  0x5f   :  { %1697 = vmatprep.subr.bf16.mxu1 %v1861_v63  ;;  %v1921_v63 = vld [vmem:[#allocation5 + $0x3d8] sm:$0xff]  }
  0x61   :  { %1676 = vmatpush3.bf16.msra.mxu0 %v1862_v0  ;;  %v1922_v0 = vld [vmem:[#allocation5 + $0x318] sm:$0xff]  }
  0x62   :  { %1698 = vmatpush3.bf16.msra.mxu1 %v1863_v1  ;;  %1677 = vmatprep.subr.bf16.mxu0 %v1864_v2  ;;  %v1923_v1 = vld [vmem:[#allocation5 + $0x398] sm:$0xff]   ;;  %v1924_v2 = vld [vmem:[#allocation5 + $0x360] sm:$0xff]  }
  0x63   :  { %1699 = vmatprep.subr.bf16.mxu1 %v1865_v3  ;;  %v1925_v3 = vld [vmem:[#allocation5 + $0x3e0] sm:$0xff]  }
  0x65   :  { %1678 = vmatpush3.bf16.msra.mxu0 %v1866_v4  ;;  %v1926_v4 = vld [vmem:[#allocation5 + $0x320] sm:$0xff]  }
  0x66   :  { %1700 = vmatpush3.bf16.msra.mxu1 %v1867_v5  ;;  %1707 = vmatprep.subr.bf16.mxu0 %v1872_v12  ;;  %v1927_v5 = vld [vmem:[#allocation5 + $0x3a0] sm:$0xff]   ;;  %v1934_v12 = vld [vmem:[#allocation5 + $0x330] sm:$0xff]  }
  0x67   :  { %1729 = vmatprep.subr.bf16.mxu1 %v1873_v13  ;;  %v1935_v13 = vld [vmem:[#allocation5 + $0x3b0] sm:$0xff]  }
  0x68   :  { %1250 = vmatmul.mubr.bf16.vlgmr.msra.gmra.mrb[4].mxu0 %v1479_v7  ;;  %v1929_v7 = vld [vmem:[#allocation5 + $0x3e8] sm:$0xff]  }
  0x69   :  { %1290 = vmatmul.mubr.bf16.vlgmr.msra.gmra.mrb[4].mxu1 %v1481_v10  ;;  %1708 = vmatpush3.bf16.msra.mxu0 %v1874_v14  ;;  %v1932_v10 = vld [vmem:[#allocation5 + $0x370] sm:$0xff]   ;;  %v1936_v14 = vld [vmem:[#allocation5 + $0x378] sm:$0xff]  }
  0x6a   :  { %1730 = vmatpush3.bf16.msra.mxu1 %v1875_v15  ;;  %1709 = vmatprep.subr.bf16.mxu0 %v1876_v16  ;;  %v1937_v15 = vld [vmem:[#allocation5 + $0x3f8] sm:$0xff]  }
  0x6b   :  { %1731 = vmatprep.subr.bf16.mxu1 %v1877_v17  ;;  %1329 = vmatprep.mubr.bf16.mxu0 %v1484_v47  ;;  %v1938_v16 = vld [vmem:[#allocation5 + $0x338] sm:$0xff]  }
  0x6c   :  { %1369 = vmatprep.mubr.bf16.mxu1 %v1486_v49  ;;  %v1939_v17 = vld [vmem:[#allocation5 + $0x3b8] sm:$0xff]  }
  0x6d   :  { %1710 = vmatpush3.bf16.msra.mxu0 %v1878_v18  ;;  %v48_v18 = vld [vmem:[#allocation2 + $0x30] sm:$0xff] }
  0x6e   :  { %1732 = vmatpush3.bf16.msra.mxu1 %v1879_v19  ;;  %1711 = vmatprep.subr.bf16.mxu0 %v1880_v20  ;;  %v49_v19 = vld [vmem:[#allocation2 + $0x38] sm:$0xff]  ;;  %v1487_v20 = vcombine.low %v48_v18, %v48_v18 }
  0x6f   :  { %1733 = vmatprep.subr.bf16.mxu1 %v1881_v21  ;;  %v1488_v21 = vcombine.high %v48_v18, %v48_v18 }
  0x71   :  { %1712 = vmatpush3.bf16.msra.mxu0 %v1882_v22  ;;  %v1489_v22 = vcombine.low %v49_v19, %v49_v19 }
  0x72   :  { %1734 = vmatpush3.bf16.msra.mxu1 %v1883_v23  ;;  %1713 = vmatprep.subr.bf16.mxu0 %v1884_v24  ;;  %v1490_v23 = vcombine.high %v49_v19, %v49_v19 }
  0x73   :  { %1735 = vmatprep.subr.bf16.mxu1 %v1885_v25 }
  0x75   :  { %1714 = vmatpush3.bf16.msra.mxu0 %v1886_v26  ;;  %v1474_v26 = vld [vmem:[%s2089_s2] ss:$0 sm:$0xff]  ;;  %s2020_s2 = smov [#allocation7]  }
  0x76   :  { %1736 = vmatpush3.bf16.msra.mxu1 %v1887_v27  ;;  %1715 = vmatprep.subr.bf16.mxu0 %v1888_v28  ;;  %s1464_s11 = sshll.u32 %s2020_s2, 4  ;;  %s1465_s11 = int_to_ptr.vmem [resolvable:$true] %s1464_s11 }
  0x77   :  { %1737 = vmatprep.subr.bf16.mxu1 %v1889_v29  ;;  %s1988_s12 = scalar_lea.vmem %s1465_s11, 128  ;;  %p1993_p3 = scmp.lt.s32.totalorder %s1465_s11, %s1465_s11 }
  0x78   :  { %p1989_p2 = scmp.ne.s32.totalorder %s1465_s11, %s1988_s12  ;;  %p1994_p4 = scmp.lt.s32.totalorder %s1988_s12, %s1988_s12 }
  0x79   :  { %1716 = vmatpush3.bf16.msra.mxu0 %v1890_v30 }
  0x7a   :  { %1738 = vmatpush3.bf16.msra.mxu1 %v1891_v31  ;;  %1717 = vmatprep.subr.bf16.mxu0 %v1892_v32  ;;  %p1995_p5 = por %p1994_p4, %p1993_p3 }
  0x7b   :  { %1739 = vmatprep.subr.bf16.mxu1 %v1893_v33 }
  0x7c   :  { %p1996_p6 = pnand %p1995_p5, %p1989_p2 }
  0x7d   :  { %1718 = vmatpush3.bf16.msra.mxu0 %v1894_v34 }
  0x7e   :  { %1740 = vmatpush3.bf16.msra.mxu1 %v1895_v35  ;;  %1719 = vmatprep.subr.bf16.mxu0 %v1896_v36 }
  0x7f   :  { %1741 = vmatprep.subr.bf16.mxu1 %v1897_v37 }
  0x81   :  { %1720 = vmatpush3.bf16.msra.mxu0 %v1898_v38 }
  0x82   :  { %1742 = vmatpush3.bf16.msra.mxu1 %v1899_v39  ;;  %1721 = vmatprep.subr.bf16.mxu0 %v1900_v40 }
  0x83   :  { %1743 = vmatprep.subr.bf16.mxu1 %v1901_v41 }
  0x85   :  { %1722 = vmatpush3.bf16.msra.mxu0 %v1902_v42 }
  0x86   :  { %1744 = vmatpush3.bf16.msra.mxu1 %v1903_v43  ;;  %1751 = vmatprep.subr.bf16.mxu0 %v1908_v50 }
  0x87   :  { %1773 = vmatprep.subr.bf16.mxu1 %v1909_v51 }
  0x88   :  { %1330 = vmatmul.mubr.bf16.vlgmr.msra.gmra.mrb[8].mxu0 %v1483_v46 }
  0x89   :  { %1370 = vmatmul.mubr.bf16.vlgmr.msra.gmra.mrb[8].mxu1 %v1485_v48  ;;  %1752 = vmatpush3.bf16.msra.mxu0 %v1910_v52 }
  0x8a   :  { %1774 = vmatpush3.bf16.msra.mxu1 %v1911_v53  ;;  %1753 = vmatprep.subr.bf16.mxu0 %v1912_v54 }
  0x8b   :  { %1775 = vmatprep.subr.bf16.mxu1 %v1913_v55  ;;  %1409 = vmatprep.mubr.bf16.mxu0 %v1488_v21 }
  0x8c   :  { %1449 = vmatprep.mubr.bf16.mxu1 %v1490_v23 }
  0x8d   :  { %1754 = vmatpush3.bf16.msra.mxu0 %v1914_v56 }
  0x8e   :  { %1776 = vmatpush3.bf16.msra.mxu1 %v1915_v57  ;;  %1755 = vmatprep.subr.bf16.mxu0 %v1916_v58 }
  0x8f   :  { %1777 = vmatprep.subr.bf16.mxu1 %v1917_v59 }
  0x91   :  { %1756 = vmatpush3.bf16.msra.mxu0 %v1918_v60 }
  0x92   :  { %1778 = vmatpush3.bf16.msra.mxu1 %v1919_v61  ;;  %1757 = vmatprep.subr.bf16.mxu0 %v1920_v62 }
  0x93   :  { %1779 = vmatprep.subr.bf16.mxu1 %v1921_v63 }
  0x95   :  { %1758 = vmatpush3.bf16.msra.mxu0 %v1922_v0 }
  0x96   :  { %1780 = vmatpush3.bf16.msra.mxu1 %v1923_v1  ;;  %1759 = vmatprep.subr.bf16.mxu0 %v1924_v2 }
  0x97   :  { %1781 = vmatprep.subr.bf16.mxu1 %v1925_v3 }
  0x99   :  { %1760 = vmatpush3.bf16.msra.mxu0 %v1926_v4 }
  0x9a   :  { %1782 = vmatpush3.bf16.msra.mxu1 %v1927_v5  ;;  %1761 = vmatprep.subr.bf16.mxu0 %v1928_v6 }
  0x9b   :  { %1783 = vmatprep.subr.bf16.mxu1 %v1929_v7 }
  0x9d   :  { %1762 = vmatpush3.bf16.msra.mxu0 %v1930_v8 }
  0x9e   :  { %1784 = vmatpush3.bf16.msra.mxu1 %v1931_v9  ;;  %1763 = vmatprep.subr.bf16.mxu0 %v1932_v10 }
  0x9f   :  { %1785 = vmatprep.subr.bf16.mxu1 %v1933_v11 }
  0xa1   :  { %1764 = vmatpush3.bf16.msra.mxu0 %v1934_v12 }
  0xa2   :  { %1786 = vmatpush3.bf16.msra.mxu1 %v1935_v13  ;;  %1765 = vmatprep.subr.bf16.mxu0 %v1936_v14 }
  0xa3   :  { %1787 = vmatprep.subr.bf16.mxu1 %v1937_v15 }
  0xa5   :  { %1766 = vmatpush3.bf16.msra.mxu0 %v1938_v16 }
  0xa6   :  { %1788 = vmatpush3.bf16.msra.mxu1 %v1939_v17 }
  0xa8   :  { %1410 = vmatmul.mubr.bf16.vlgmr.msra.gmra.mrb[12].mxu0 %v1487_v20 }
  0xa9   :  { %1450 = vmatmul.mubr.bf16.vlgmr.msra.gmra.mrb[12].mxu1 %v1489_v22 }
 0x11b   :  { %v1635_v24 = vpop.f32.mrb[0].mxu0 }
 0x11c   :  { %v1657_v25 = vpop.f32.mrb[0].mxu1  ;;  %v1636_v27 = vpop.f32.mrb[1].mxu0 }
 0x11d   :  { %v1658_v28 = vpop.f32.mrb[1].mxu1  ;;  %v1637_v29 = vadd.f32 %v1636_v27, %v1635_v24  ;;  %v1638_v31 = vpop.f32.mrb[2].mxu0 }
 0x11e   :  { %v1659_v30 = vadd.f32 %v1658_v28, %v1657_v25  ;;  %v1660_v32 = vpop.f32.mrb[2].mxu1  ;;  %v1639_v33 = vpop.f32.mrb[3].mxu0 }
 0x11f   :  { %v1661_v34 = vpop.f32.mrb[3].mxu1  ;;  %v1172_v35 = vadd.f32 %v1637_v29, %v1474_v26 }
 0x121   :  { %v1212_v36 = vadd.f32 %v1659_v30, %v1172_v35 }
 0x13b   :  { %v1679_v37 = vpop.f32.mrb[4].mxu0 }
 0x13c   :  { %v1701_v38 = vpop.f32.mrb[4].mxu1  ;;  %v1680_v39 = vpop.f32.mrb[5].mxu0 }
 0x13d   :  { %v1702_v40 = vpop.f32.mrb[5].mxu1  ;;  %v1681_v41 = vadd.f32 %v1680_v39, %v1679_v37  ;;  %v1682_v43 = vpop.f32.mrb[6].mxu0 }
 0x13e   :  { %v1703_v42 = vadd.f32 %v1702_v40, %v1701_v38  ;;  %v1704_v44 = vpop.f32.mrb[6].mxu1  ;;  %v1683_v45 = vpop.f32.mrb[7].mxu0 }
 0x13f   :  { %v1705_v46 = vpop.f32.mrb[7].mxu1  ;;  %v1252_v47 = vadd.f32 %v1681_v41, %v1212_v36 }
 0x141   :  { %v1292_v48 = vadd.f32 %v1703_v42, %v1252_v47 }
 0x15b   :  { %v1723_v49 = vpop.f32.mrb[8].mxu0 }
 0x15c   :  { %v1745_v50 = vpop.f32.mrb[8].mxu1  ;;  %v1724_v51 = vpop.f32.mrb[9].mxu0 }
 0x15d   :  { %v1725_v52 = vadd.f32 %v1724_v51, %v1723_v49  ;;  %v1746_v53 = vpop.f32.mrb[9].mxu1  ;;  %v1726_v54 = vpop.f32.mrb[10].mxu0 }
 0x15e   :  { %v1747_v55 = vadd.f32 %v1746_v53, %v1745_v50  ;;  %v1748_v56 = vpop.f32.mrb[10].mxu1  ;;  %v1727_v57 = vpop.f32.mrb[11].mxu0 }
 0x15f   :  { %v1332_v58 = vadd.f32 %v1725_v52, %v1292_v48  ;;  %v1749_v59 = vpop.f32.mrb[11].mxu1 }
 0x161   :  { %v1372_v60 = vadd.f32 %v1747_v55, %v1332_v58 }
 0x17b   :  { %v1767_v61 = vpop.f32.mrb[12].mxu0 }
 0x17c   :  { %v1789_v62 = vpop.f32.mrb[12].mxu1  ;;  %v1768_v63 = vpop.f32.mrb[13].mxu0 }
 0x17d   :  { %v1769_v0 = vadd.f32 %v1768_v63, %v1767_v61  ;;  %v1790_v1 = vpop.f32.mrb[13].mxu1  ;;  %v1770_v2 = vpop.f32.mrb[14].mxu0 }
 0x17e   :  { %v1791_v3 = vadd.f32 %v1790_v1, %v1789_v62  ;;  %v1792_v4 = vpop.f32.mrb[14].mxu1  ;;  %v1771_v5 = vpop.f32.mrb[15].mxu0 }
 0x17f   :  { %v1412_v6 = vadd.f32 %v1769_v0, %v1372_v60  ;;  %v1793_v7 = vpop.f32.mrb[15].mxu1 }
 0x181   :  { %v1452_v8 = vadd.f32 %v1791_v3, %v1412_v6 }
 0x183   :  { %1457 = vst [vmem:[#allocation7] sm:$0xff] %v1452_v8 }
 0x184   :  { %1999 = shalt.err (!%p1996_p6)
}
 0x185   :  { %s2000_s15 = scalar_lea.hbm %s2090_s3, 128 }
 0x186   :  { %p2001_p7 = scmp.ne.s32.totalorder %s2090_s3, %s2000_s15  ;;  %p2004_p8 = scmp.lt.u32.totalorder %s2000_s15, %s2090_s3 }
 0x188   :  { %p2006_p9 = pnand %p2004_p8, %p2001_p7 }
 0x18a   :  { %2009 = shalt.err (!%p2006_p9)
}
 0x18b   :  { %1467 = dma.vmem_to_hbm [thread:$0]  %s1465_s11, 128, %s2090_s3, [#allocation4]  }
 0x18c   :  { %2014 = dma.done.wait [#allocation4], 128  }
 0x18d   :  { %2015 = vsyncadd [#allocation4], 4294967168 }
 0x18e   :  { %1471 = vsyncpa [#allocation3], 1 }
 0x18f   :  { %1472 = vsyncpa [#allocation6], 1 }
 0x190   :  { %1473 = vsyncpa [#allocation4], 1 }

</bundles_post_ra>
